<compile_context>
chip_gen: v5e
topology: v5e:2x2
jax: 0.10.0
libtpu: 0.0.40
codegen_flags: <defaults>
</compile_context>

<pallas_src>
import functools

import jax
import jax.numpy as jnp
from jax.experimental import pallas as pl
from jax.experimental.pallas import tpu as pltpu


def _withgrad_kernel(x_ref, w_ref, b_ref, lbl_ref, dw_ref, db_ref,
                     *, batch, tile_b, inv_b, mask_rows):
    """One batch tile of dL/dW, dL/db for L = mean(softmax_xent(xW + b, labels))."""
    step = pl.program_id(0)

    x = x_ref[...]                                   # [TB, H]   (native dtype)
    w = w_ref[...]                                   # [H, Cp]   (native dtype)
    bias = b_ref[...]                                # [1, Cp]   f32 (-1e9 on pad cols)
    lbl = lbl_ref[...]                               # [TB, 1]   int32

    # ---- forward: logits + numerically-stable softmax ----
    logits = jnp.dot(x, w, preferred_element_type=jnp.float32) + bias   # [TB, Cp]
    m = jnp.max(logits, axis=-1, keepdims=True)
    e = jnp.exp(logits - m)
    denom = jnp.sum(e, axis=-1, keepdims=True)
    p = e * pl.reciprocal(denom, approx=True)        # softmax probs (EUP recip)

    # ---- dL/dlogits = p - onehot(label); 1/B folded into finalize ----
    cls = jax.lax.broadcasted_iota(jnp.int32, p.shape, 1)
    g = p - (cls == lbl).astype(jnp.float32)         # [TB, Cp] f32
    if mask_rows:                                    # zero out padded batch rows
        row = jax.lax.broadcasted_iota(jnp.int32, p.shape, 0) + step * tile_b
        g = jnp.where(row < batch, g, 0.0)

    # ---- per-tile gradient contributions ----
    # dW: contract the batch axis of x and g directly (no x.T materialization).
    gd = g.astype(x.dtype)                           # bf16 MXU feed when inputs are bf16
    contrib_w = jax.lax.dot_general(
        x, gd,
        dimension_numbers=(((0,), (0,)), ((), ())),
        preferred_element_type=jnp.float32)          # [H, Cp]
    contrib_b = jnp.sum(g, axis=0, keepdims=True)    # [1, Cp]

    # ---- accumulate directly into the resident output blocks ----
    @pl.when(step == 0)
    def _init():
        dw_ref[...] = contrib_w
        db_ref[...] = contrib_b

    @pl.when(step > 0)
    def _accum():
        dw_ref[...] += contrib_w
        db_ref[...] += contrib_b

    @pl.when(step == pl.num_programs(0) - 1)
    def _finalize():
        dw_ref[...] = dw_ref[...] * inv_b
        db_ref[...] = db_ref[...] * inv_b


def _pick_batch_tile(H, Cp, in_bytes, budget_bytes=6 * 1024 * 1024):
    """Largest batch tile whose double-buffered inputs + f32 intermediates fit a
    conservative VMEM budget (safe on v5e/v6e/v7x scoped defaults)."""
    per_row = 2 * (in_bytes * H + 4) + 5 * Cp * 4    # 2x(x row + label) + ~5 f32 [Cp] temps
    tb = max(8, min(1024, budget_bytes // max(per_row, 1)))
    return (tb // 8) * 8


def with_grad_ms(x, w, b, labels, *, batch_tile=None):
    """Returns (dW, db): gradients of mean softmax-CE through logits = x @ W + b."""
    B, H = x.shape
    Hw, C = w.shape
    assert Hw == H

    # --- lane-dense class padding (pad classes get -1e9 bias -> softmax ~0) ---
    Cp = pl.cdiv(C, 128) * 128

    in_bytes = jnp.dtype(x.dtype).itemsize
    if batch_tile is None:
        batch_tile = _pick_batch_tile(H, Cp, in_bytes)
    TB = min(batch_tile, pl.cdiv(B, 8) * 8)
    TB = max(8, (TB // 8) * 8)
    Bp = pl.cdiv(B, TB) * TB
    grid_b = Bp // TB

    x_p = jnp.zeros((Bp, H), x.dtype).at[:B, :].set(x)
    w_p = jnp.zeros((H, Cp), w.dtype).at[:, :C].set(w)
    b_p = jnp.full((1, Cp), -1e9, jnp.float32).at[0, :C].set(b.astype(jnp.float32))
    lbl_p = jnp.zeros((Bp, 1), jnp.int32).at[:B, 0].set(labels.astype(jnp.int32))

    kernel = functools.partial(
        _withgrad_kernel,
        batch=B, tile_b=TB, inv_b=float(1.0 / B), mask_rows=(Bp != B))

    w_bytes = jnp.dtype(w.dtype).itemsize
    cost = pl.CostEstimate(
        flops=4 * Bp * H * Cp,                       # forward + dW matmuls
        transcendentals=Bp * Cp,                     # exp
        bytes_accessed=in_bytes * Bp * H + w_bytes * H * Cp
                       + 4 * (Cp + Bp) + 4 * (H * Cp + Cp))

    dw, db = pl.pallas_call(
        kernel,
        out_shape=(
            jax.ShapeDtypeStruct((H, Cp), jnp.float32),
            jax.ShapeDtypeStruct((1, Cp), jnp.float32),
        ),
        grid_spec=pltpu.PrefetchScalarGridSpec(
            num_scalar_prefetch=0,
            grid=(grid_b,),
            in_specs=[
                pl.BlockSpec((TB, H), lambda i: (i, 0)),    # x batch tile
                pl.BlockSpec((H, Cp), lambda i: (0, 0)),    # W: grid-invariant
                pl.BlockSpec((1, Cp), lambda i: (0, 0)),    # bias: grid-invariant
                pl.BlockSpec((TB, 1), lambda i: (i, 0)),    # int labels tile
            ],
            out_specs=(
                pl.BlockSpec((H, Cp), lambda i: (0, 0)),    # dW (resident accumulator)
                pl.BlockSpec((1, Cp), lambda i: (0, 0)),    # db (resident accumulator)
            ),
        ),
        compiler_params=pltpu.CompilerParams(
            dimension_semantics=("arbitrary",),             # batch axis is a reduction
            vmem_limit_bytes=32 * 1024 * 1024,
        ),
        cost_estimate=cost,
    )(x_p, w_p, b_p, lbl_p)

    return dw[:, :C], db[0, :C]


def _reference_grads(x, w, b, labels):
    """Pure-JAX reference: jax.grad of softmax cross entropy through the dense layer."""
    y = jax.nn.one_hot(labels, w.shape[1], dtype=jnp.float32)

    def loss_fn(params):
        w_, b_ = params
        logits = x @ w_ + b_
        logp = jax.nn.log_softmax(logits, axis=-1)
        return -jnp.mean(jnp.sum(y * logp, axis=-1))

    return jax.grad(loss_fn)((w, b))


if __name__ == "__main__":
    key = jax.random.PRNGKey(0)
    k_x, k_w, k_b, k_lbl = jax.random.split(key, 4)

    B, H, C = 8, 32, 16                     # batch=8, hidden=32, classes=16
    x = jax.random.normal(k_x, (B, H), dtype=jnp.float32)
    w = jax.random.normal(k_w, (H, C), dtype=jnp.float32) * 0.1
    b = jax.random.normal(k_b, (C,), dtype=jnp.float32) * 0.1
    labels = jax.random.randint(k_lbl, (B,), 0, C)

    # f32 path (v5e-friendly): strict-ish check (approx reciprocal ~1e-4 rel).
    dw, db = with_grad_ms(x, w, b, labels)
    dw = jax.block_until_ready(dw)
    db = jax.block_until_ready(db)
    ref_dw, ref_db = _reference_grads(x, w, b, labels)
    assert jnp.allclose(dw, ref_dw, atol=1e-3, rtol=1e-3)
    assert jnp.allclose(db, ref_db, atol=1e-3, rtol=1e-3)

    # bf16 MXU path (v6e/v7x recommendation): bf16 operands, f32 accumulation.
    xb = x.astype(jnp.bfloat16)
    wb = w.astype(jnp.bfloat16)
    dw16, db16 = with_grad_ms(xb, wb, b, labels)
    dw16 = jax.block_until_ready(dw16)
    db16 = jax.block_until_ready(db16)
    ref_dw16, ref_db16 = _reference_grads(
        xb.astype(jnp.float32), wb.astype(jnp.float32), b, labels)
    assert jnp.allclose(dw16, ref_dw16, atol=5e-3, rtol=5e-2)
    assert jnp.allclose(db16, ref_db16, atol=5e-3, rtol=5e-2)

    print("KERNEL_OK")
</pallas_src>

<mosaic_0001>
module attributes {stable_mosaic.version = 11 : i64} {
  func.func @_withgrad_kernel(%arg0: i32, %arg1: memref<8x32xf32, #tpu.memory_space<vmem>>, %arg2: memref<32x128xf32, #tpu.memory_space<vmem>>, %arg3: memref<1x128xf32, #tpu.memory_space<vmem>>, %arg4: memref<8x1xi32, #tpu.memory_space<vmem>>, %arg5: memref<32x128xf32, #tpu.memory_space<vmem>>, %arg6: memref<1x128xf32, #tpu.memory_space<vmem>>) attributes {dimension_semantics = [#tpu.dimension_semantics<arbitrary>], iteration_bounds = array<i64: 1>, scalar_prefetch = 0 : i64, scratch_operands = 0 : i64, tpu.core_type = #tpu.core_type<tc>, window_params = [{transform_indices = @transform_0, window_bounds = array<i64: 8, 32>}, {pipeline_mode = #tpu.pipeline_mode<synchronous>, transform_indices = @transform_1, window_bounds = array<i64: 32, 128>}, {pipeline_mode = #tpu.pipeline_mode<synchronous>, transform_indices = @transform_2, window_bounds = array<i64: 1, 128>}, {transform_indices = @transform_3, window_bounds = array<i64: 8, 1>}, {pipeline_mode = #tpu.pipeline_mode<synchronous>, transform_indices = @transform_4, window_bounds = array<i64: 32, 128>}, {pipeline_mode = #tpu.pipeline_mode<synchronous>, transform_indices = @transform_5, window_bounds = array<i64: 1, 128>}]} {
    %c0 = arith.constant 0 : index
    %c0_0 = arith.constant 0 : index
    %0 = vector.load %arg1[%c0, %c0_0] : memref<8x32xf32, #tpu.memory_space<vmem>>, vector<8x32xf32>
    %c0_1 = arith.constant 0 : index
    %c0_2 = arith.constant 0 : index
    %1 = vector.load %arg2[%c0_1, %c0_2] : memref<32x128xf32, #tpu.memory_space<vmem>>, vector<32x128xf32>
    %c0_3 = arith.constant 0 : index
    %c0_4 = arith.constant 0 : index
    %2 = vector.load %arg3[%c0_3, %c0_4] : memref<1x128xf32, #tpu.memory_space<vmem>>, vector<1x128xf32>
    %c0_5 = arith.constant 0 : index
    %c0_6 = arith.constant 0 : index
    %3 = vector.load %arg4[%c0_5, %c0_6] : memref<8x1xi32, #tpu.memory_space<vmem>>, vector<8x1xi32>
    %cst = arith.constant dense<0.000000e+00> : vector<8x128xf32>
    %4 = tpu.matmul %0, %1, %cst {dimension_numbers = #tpu.dot_dimension_numbers<[1], [0], [0], [1], [0, 0, 1, 1], [], []>} : vector<8x32xf32>, vector<32x128xf32>, vector<8x128xf32> -> vector<8x128xf32>
    %5 = vector.broadcast %2 : vector<1x128xf32> to vector<8x128xf32>
    %6 = arith.addf %4, %5 : vector<8x128xf32>
    %cst_7 = arith.constant dense<0xFF800000> : vector<8xf32>
    %7 = vector.multi_reduction <maximumf>, %6, %cst_7 [1] : vector<8x128xf32> to vector<8xf32>
    %8 = vector.shape_cast %7 : vector<8xf32> to vector<8x1xf32>
    %9 = vector.broadcast %8 : vector<8x1xf32> to vector<8x128xf32>
    %10 = arith.subf %6, %9 : vector<8x128xf32>
    %11 = math.exp %10 : vector<8x128xf32>
    %cst_8 = arith.constant dense<0.000000e+00> : vector<8xf32>
    %12 = vector.multi_reduction <add>, %11, %cst_8 [1] : vector<8x128xf32> to vector<8xf32>
    %13 = vector.shape_cast %12 : vector<8xf32> to vector<8x1xf32>
    %14 = tpu.reciprocal %13 {approx = true} : vector<8x1xf32> -> vector<8x1xf32>
    %15 = vector.broadcast %14 : vector<8x1xf32> to vector<8x128xf32>
    %16 = arith.mulf %11, %15 : vector<8x128xf32>
    %17 = tpu.iota {dimensions = array<i32: 1>} : vector<8x128xi32>
    %18 = vector.broadcast %3 : vector<8x1xi32> to vector<8x128xi32>
    %19 = arith.cmpi eq, %17, %18 : vector<8x128xi32>
    %20 = arith.extui %19 : vector<8x128xi1> to vector<8x128xi32>
    %21 = arith.sitofp %20 : vector<8x128xi32> to vector<8x128xf32>
    %22 = arith.subf %16, %21 : vector<8x128xf32>
    %cst_9 = arith.constant dense<0.000000e+00> : vector<32x128xf32>
    %23 = tpu.matmul %0, %22, %cst_9 {dimension_numbers = #tpu.dot_dimension_numbers<[0], [0], [1], [1], [0, 1, 1, 1], [], []>} : vector<8x32xf32>, vector<8x128xf32>, vector<32x128xf32> -> vector<32x128xf32>
    %cst_10 = arith.constant dense<0.000000e+00> : vector<128xf32>
    %24 = vector.multi_reduction <add>, %22, %cst_10 [0] : vector<8x128xf32> to vector<128xf32>
    %25 = vector.shape_cast %24 : vector<128xf32> to vector<1x128xf32>
    %c0_i32 = arith.constant 0 : i32
    %26 = arith.cmpi eq, %arg0, %c0_i32 : i32
    %27 = arith.extui %26 : i1 to i32
    %c0_i32_11 = arith.constant 0 : i32
    %28 = arith.cmpi ne, %27, %c0_i32_11 : i32
    scf.if %28 {
      %c0_16 = arith.constant 0 : index
      %c0_17 = arith.constant 0 : index
      %35 = vector.load %arg5[%c0_16, %c0_17] : memref<32x128xf32, #tpu.memory_space<vmem>>, vector<32x128xf32>
      tpu.vector_store %arg5[%c0_16, %c0_17], %23 {strides = array<i32>} : memref<32x128xf32, #tpu.memory_space<vmem>>, vector<32x128xf32>,
      %c0_18 = arith.constant 0 : index
      %c0_19 = arith.constant 0 : index
      %36 = vector.load %arg6[%c0_18, %c0_19] : memref<1x128xf32, #tpu.memory_space<vmem>>, vector<1x128xf32>
      tpu.vector_store %arg6[%c0_18, %c0_19], %25 {strides = array<i32>} : memref<1x128xf32, #tpu.memory_space<vmem>>, vector<1x128xf32>,
    } else {
    }
    %c0_i32_12 = arith.constant 0 : i32
    %29 = arith.cmpi sgt, %arg0, %c0_i32_12 : i32
    %30 = arith.extui %29 : i1 to i32
    %c0_i32_13 = arith.constant 0 : i32
    %31 = arith.cmpi ne, %30, %c0_i32_13 : i32
    scf.if %31 {
      %c0_16 = arith.constant 0 : index
      %c0_17 = arith.constant 0 : index
      %35 = vector.load %arg5[%c0_16, %c0_17] : memref<32x128xf32, #tpu.memory_space<vmem>>, vector<32x128xf32>
      %36 = arith.addf %35, %23 : vector<32x128xf32>
      %c0_18 = arith.constant 0 : index
      %c0_19 = arith.constant 0 : index
      %37 = vector.load %arg5[%c0_18, %c0_19] : memref<32x128xf32, #tpu.memory_space<vmem>>, vector<32x128xf32>
      tpu.vector_store %arg5[%c0_18, %c0_19], %36 {strides = array<i32>} : memref<32x128xf32, #tpu.memory_space<vmem>>, vector<32x128xf32>,
      %c0_20 = arith.constant 0 : index
      %c0_21 = arith.constant 0 : index
      %38 = vector.load %arg6[%c0_20, %c0_21] : memref<1x128xf32, #tpu.memory_space<vmem>>, vector<1x128xf32>
      %39 = arith.addf %38, %25 : vector<1x128xf32>
      %c0_22 = arith.constant 0 : index
      %c0_23 = arith.constant 0 : index
      %40 = vector.load %arg6[%c0_22, %c0_23] : memref<1x128xf32, #tpu.memory_space<vmem>>, vector<1x128xf32>
      tpu.vector_store %arg6[%c0_22, %c0_23], %39 {strides = array<i32>} : memref<1x128xf32, #tpu.memory_space<vmem>>, vector<1x128xf32>,
    } else {
    }
    %c0_i32_14 = arith.constant 0 : i32
    %32 = arith.cmpi eq, %arg0, %c0_i32_14 : i32
    %33 = arith.extui %32 : i1 to i32
    %c0_i32_15 = arith.constant 0 : i32
    %34 = arith.cmpi ne, %33, %c0_i32_15 : i32
    scf.if %34 {
      %c0_16 = arith.constant 0 : index
      %c0_17 = arith.constant 0 : index
      %35 = vector.load %arg5[%c0_16, %c0_17] : memref<32x128xf32, #tpu.memory_space<vmem>>, vector<32x128xf32>
      %cst_18 = arith.constant 1.250000e-01 : f32
      %36 = vector.broadcast %cst_18 : f32 to vector<32x128xf32>
      %37 = arith.mulf %35, %36 : vector<32x128xf32>
      %c0_19 = arith.constant 0 : index
      %c0_20 = arith.constant 0 : index
      %38 = vector.load %arg5[%c0_19, %c0_20] : memref<32x128xf32, #tpu.memory_space<vmem>>, vector<32x128xf32>
      tpu.vector_store %arg5[%c0_19, %c0_20], %37 {strides = array<i32>} : memref<32x128xf32, #tpu.memory_space<vmem>>, vector<32x128xf32>,
      %c0_21 = arith.constant 0 : index
      %c0_22 = arith.constant 0 : index
      %39 = vector.load %arg6[%c0_21, %c0_22] : memref<1x128xf32, #tpu.memory_space<vmem>>, vector<1x128xf32>
      %cst_23 = arith.constant 1.250000e-01 : f32
      %40 = vector.broadcast %cst_23 : f32 to vector<1x128xf32>
      %41 = arith.mulf %39, %40 : vector<1x128xf32>
      %c0_24 = arith.constant 0 : index
      %c0_25 = arith.constant 0 : index
      %42 = vector.load %arg6[%c0_24, %c0_25] : memref<1x128xf32, #tpu.memory_space<vmem>>, vector<1x128xf32>
      tpu.vector_store %arg6[%c0_24, %c0_25], %41 {strides = array<i32>} : memref<1x128xf32, #tpu.memory_space<vmem>>, vector<1x128xf32>,
    } else {
    }
    return
  }
  func.func @transform_0(%arg0: i32) -> (i32, i32) {
    %c0_i32 = arith.constant 0 : i32
    %c0_i32_0 = arith.constant 0 : i32
    return %arg0, %c0_i32 : i32, i32
  }
  func.func @transform_1(%arg0: i32) -> (i32, i32) {
    %c0_i32 = arith.constant 0 : i32
    %c0_i32_0 = arith.constant 0 : i32
    %c0_i32_1 = arith.constant 0 : i32
    return %c0_i32, %c0_i32_0 : i32, i32
  }
  func.func @transform_2(%arg0: i32) -> (i32, i32) {
    %c0_i32 = arith.constant 0 : i32
    %c0_i32_0 = arith.constant 0 : i32
    %c0_i32_1 = arith.constant 0 : i32
    return %c0_i32, %c0_i32_0 : i32, i32
  }
  func.func @transform_3(%arg0: i32) -> (i32, i32) {
    %c0_i32 = arith.constant 0 : i32
    %c0_i32_0 = arith.constant 0 : i32
    return %arg0, %c0_i32 : i32, i32
  }
  func.func @transform_4(%arg0: i32) -> (i32, i32) {
    %c0_i32 = arith.constant 0 : i32
    %c0_i32_0 = arith.constant 0 : i32
    %c0_i32_1 = arith.constant 0 : i32
    return %c0_i32, %c0_i32_0 : i32, i32
  }
  func.func @transform_5(%arg0: i32) -> (i32, i32) {
    %c0_i32 = arith.constant 0 : i32
    %c0_i32_0 = arith.constant 0 : i32
    %c0_i32_1 = arith.constant 0 : i32
    return %c0_i32, %c0_i32_0 : i32, i32
  }
}

</mosaic_0001>

<bundles_post_ra>
// kernel: tpu_custom_call.1
= control target key start
LH: loop header
LB: loop body
LE: loop exit
PB: predicated region body
PF: predicated region fallthrough
CT: control target
= control target key end

     0   :  { %11 = vsyncpa [#allocation3], 0  ;;  %s411_s0 = inlined_call_operand.vmem [shape: f32[8,32], index: 0, kind: input, shape index: {}]   ;;  %s412_s1 = inlined_call_operand.hbm [shape: f32[32,128], index: 1, kind: input, shape index: {}]   ;;  %s413_s2 = inlined_call_operand.vmem [shape: f32[1,128], index: 2, kind: input, shape index: {}]   ;;  %s414_s3 = inlined_call_operand.vmem [shape: s32[8,1], index: 3, kind: input, shape index: {}]   ;;  %s415_s4 = inlined_call_operand.hbm [shape: f32[32,128], index: 4, kind: output, shape index: {0}]   ;;  %s416_s5 = inlined_call_operand.hbm [shape: f32[1,128], index: 5, kind: output, shape index: {1}]  }
   0x1   :  { %12 = vsyncpa [#allocation4], 0 }
   0x2   :  { %13 = vsyncpa [#allocation7], 0  ;;  %s20_s20 = sshll.u32 %s412_s1, 4  ;;  %s350_s21 = smov [#allocation2]   ;;  %s21_s20 = int_to_ptr.hbm [resolvable:$true] %s20_s20 }
   0x3   :  { %s22_s22 = sshll.u32 %s350_s21, 4  ;;  %s351_s23 = smov 128   ;;  %s23_s22 = int_to_ptr.vmem [resolvable:$true] %s22_s22 }
   0x4   :  { %s352_s24 = smov 8  }
   0x5   :  { %28 = dma.hbm_to_vmem [thread:$0]  %s21_s20, 512, %s23_s22, [#allocation3], %s351_s23, %s351_s23, %s352_s24  }
   0x6   :  { %344 = dma.done.wait [#allocation3], 512  }
   0x7   :  { %345 = vsyncadd [#allocation3], 4294966784  ;;  %v41_v0 = vld [vmem:[#allocation2 + $0x18] sm:$0xff]  ;;  %v40_v1 = vld [vmem:[#allocation2 + $0x10] sm:$0xff]  ;;  %vm47_vm0 = vcmask 261120   ;;  %v353_v6 = vmov 0   ;;  %v80_v17 = vlaneseq }
   0x8   :  { %63 = vmatpush.msra.mxu0 %v41_v0  ;;  %v39_v2 = vld [vmem:[#allocation2 + $0x8] sm:$0xff]  ;;  %v38_v3 = vld [vmem:[#allocation2] sm:$0xff]  ;;  %265 = vset.pattern.permute.xlu1 %v353_v6  ;;  %v354_v23 = vmov 0.0   ;;  %vm121_vm2 = vcmask 64512   ;;  %s235_s6 = sshll.u32 %s416_s5, 4  ;;  %s356_s7 = smov [#allocation5]   ;;  %s236_s6 = int_to_ptr.hbm [resolvable:$true] %s235_s6 }
   0x9   :  { %v37_v4 = vld [vmem:[%s411_s0] sm:$0xff]  ;;  %266 = vset.pattern.permute.xlu0 %v353_v6  ;;  %v81_v20 = vand.u32 127, %v80_v17  ;;  %s355_s0 = smov [#allocation6]   ;;  %s219_s8 = sshll.u32 %s356_s7, 4  ;;  %s220_s8 = int_to_ptr.vmem [resolvable:$true] %s219_s8 }
   0xa   :  { %64 = vmatpush.msra.mxu0 %v40_v1  ;;  %v43_v5 = vld [vmem:[%s414_s3] sm:$0xff]  ;;  %s221_s5 = sshll.u32 %s415_s4, 4  ;;  %s222_s5 = int_to_ptr.hbm [resolvable:$true] %s221_s5 }
   0xb   :  { %83 = vperm.xlu1 %265, %v43_v5   ;;  %v267_v7 = vld [vmem:[%s413_s2] ss:$0 sm:$0xff]  ;;  %s233_s2 = sshll.u32 %s355_s0, 4  ;;  %s234_s2 = int_to_ptr.vmem [resolvable:$true] %s233_s2 }
   0xc   :  { %65 = vmatpush.msra.mxu0 %v39_v2 }
   0xe   :  { %66 = vmatpush.msra.mxu0 %v38_v3 }
   0xf   :  { %250 = vmatmul.msk.f32.vlgmr.msra.gmra.mxu0 %vm47_vm0, %v37_v4 }
  0x40   :  { %89 = vxpose.xlu1.b32.start.end [1/1] (short) (narrow) %v37_v4, 32 }
  0x7d   :  { %v84_v14 = vpop.permute.xlu1 %83 }
  0x7e   :  { %vm85_vm1 = vcmp.eq.s32.totalorder %v81_v20, %v84_v14 }
  0x7f   :  { %v251_v24 = vsel %vm85_vm1, 1.0, %v354_v23 }
  0x8c   :  { %v68_v8 = vpop.f32.mrf.mxu0 }
  0x8d   :  { %v69_v9 = vadd.f32 %v267_v7, %v68_v8 }
  0x8f   :  { %71 = vmax.xlane.f32.xlu0 %v69_v9 }
  0xe4   :  { %v105_v15 = vpop.trf.xlu1 }
  0xec   :  { %v106_v16 = vpop.trf.xlu1 }
  0xf4   :  { %v107_v19 = vpop.trf.xlu1 }
  0xfc   :  { %v108_v26 = vpop.trf.xlu1 }
 0x102   :  { %v72_v10 = vpop.xlane.xlu0 %71 }
 0x103   :  { %v73_v11 = vsub.f32 %v69_v9, %v72_v10 }
 0x105   :  { %v74_v12 = vmul.f32 1.442695, %v73_v11 }
 0x107   :  { %268 = vpow2.f32 %v74_v12 }
 0x10d   :  { %v269_v13 = vpop.eup %268 }
 0x10e   :  { %76 = vadd.xlane.f32.xlu0 %v269_v13 }
 0x181   :  { %v77_v18 = vpop.xlane.xlu0 %76 }
 0x182   :  { %270 = vrcp.f32 %v77_v18 }
 0x188   :  { %v271_v21 = vpop.eup %270 }
 0x189   :  { %v79_v22 = vmul.f32 %v271_v21, %v269_v13 }
 0x18b   :  { %v88_v25 = vsub.f32 %v79_v22, %v251_v24 }
 0x18d   :  { %149 = vmatpush.msra.mxu1 %v88_v25  ;;  %256 = vmatpush.msra.mxu2 %v88_v25  ;;  %v163_v27 = vrot.slane %v88_v25, 4 }
 0x18e   :  { %257 = vmatpush.msra.mxu3 %v88_v25  ;;  %252 = vmatmul.msk.f32.vlgmr.msra.gmra.mxu1 %vm121_vm2, %v105_v15 }
 0x18f   :  { %253 = vmatmul.msk.f32.vlgmr.msra.gmra.mxu2 %vm121_vm2, %v106_v16  ;;  %255 = vmatmul.msk.f32.vlgmr.msra.gmra.mxu3 %vm121_vm2, %v108_v26  ;;  %v164_v28 = vadd.f32 %v163_v27, %v88_v25 }
 0x191   :  { %v165_v29 = vrot.slane %v164_v28, 2 }
 0x193   :  { %v166_v30 = vadd.f32 %v165_v29, %v164_v28 }
 0x195   :  { %v167_v31 = vrot.slane %v166_v30, 1 }
 0x197   :  { %254 = vmatmul.msk.f32.gmra.mxu2 %vm121_vm2, %v107_v19  ;;  %v168_v32 = vadd.f32 %v167_v31, %v166_v30 }
 0x199   :  { %177 = vst [vmem:[#allocation6] sm:$0x1] %v168_v32 }
 0x1a0   :  { %v212_v33 = vld [vmem:[#allocation6] sm:$0x1] }
 0x1a1   :  { %v213_v34 = vmul.f32 0.125, %v212_v33 }
 0x1a3   :  { %214 = vst [vmem:[#allocation6] sm:$0x1] %v213_v34 }
 0x1a4   :  { %238 = dma.vmem_to_hbm [thread:$0]  %s234_s2, 16, %s236_s6, [#allocation7]  }
 0x20b   :  { %v151_v35 = vpop.f32.mrf.mxu1 }
 0x20c   :  { %v204_v36 = vmul.f32 0.125, %v151_v35 }
 0x20e   :  { %208 = vst [vmem:[#allocation5] sm:$0xff] %v204_v36 }
 0x212   :  { %v154_v37 = vpop.f32.mrf.mxu2  ;;  %v160_v38 = vpop.f32.mrf.mxu3 }
 0x213   :  { %v205_v39 = vmul.f32 0.125, %v154_v37  ;;  %v207_v40 = vmul.f32 0.125, %v160_v38 }
 0x215   :  { %209 = vst [vmem:[#allocation5 + $0x8] sm:$0xff] %v205_v39 }
 0x216   :  { %211 = vst [vmem:[#allocation5 + $0x18] sm:$0xff] %v207_v40 }
 0x21a   :  { %v157_v41 = vpop.f32.mrf.mxu2 }
 0x21b   :  { %v206_v42 = vmul.f32 0.125, %v157_v41 }
 0x21d   :  { %210 = vst [vmem:[#allocation5 + $0x10] sm:$0xff] %v206_v42 }
 0x21e   :  { %227 = dma.vmem_to_hbm [thread:$0]  %s220_s8, 512, %s222_s5, [#allocation4], %s351_s23, %s351_s23, %s352_s24  }
 0x21f   :  { %346 = dma.done.wait [#allocation4], 512  }
 0x220   :  { %347 = vsyncadd [#allocation4], 4294966784 }
 0x221   :  { %348 = dma.done.wait [#allocation7], 16  }
 0x222   :  { %349 = vsyncadd [#allocation7], 4294967280 }
 0x223   :  { %247 = vsyncpa [#allocation3], 1 }
 0x224   :  { %248 = vsyncpa [#allocation4], 1 }
 0x225   :  { %249 = vsyncpa [#allocation7], 1 }

</bundles_post_ra>
